<compile_context>
chip_gen: v7x
topology: tpu7x:2x2x1
jax: 0.10.0
libtpu: 0.0.40
codegen_flags: <defaults>
</compile_context>

<pallas_src>
import functools

import jax
import jax.numpy as jnp
from jax import lax
from jax.experimental import pallas as pl
from jax.experimental.pallas import tpu as pltpu


def _round_up(x, m):
    return (x + m - 1) // m * m


def _contrastive_kernel(im_ref, s_ref, d1_ref, d2_ref, out_ref,
                        rowmax_ref, colmax_ref, *,
                        n, n_pad, margin, max_violation):
    i = pl.program_id(0)
    j = pl.program_id(1)
    ni = pl.num_programs(0)
    nj = pl.num_programs(1)
    tm = im_ref.shape[0]
    tn = s_ref.shape[0]

    @pl.when((i == 0) & (j == 0))
    def _init():
        out_ref[0, 0] = jnp.float32(0.0)

    # scores tile = im_tile @ s_tile.T : contract dim 1 of both operands so
    # Mosaic feeds s in its natural (tn, D) layout (no transpose copy), and
    # accumulate in f32 on the MXU (inputs stay in their native dtype).
    scores = lax.dot_general(
        im_ref[...], s_ref[...],
        dimension_numbers=(((1,), (1,)), ((), ())),
        preferred_element_type=jnp.float32,
    )  # (tm, tn) f32

    d1 = d1_ref[...].astype(jnp.float32)  # (tm, 1): diag values for this row tile
    d2 = d2_ref[...].astype(jnp.float32)  # (1, tn): diag values for this col tile

    row_g = i * tm + lax.broadcasted_iota(jnp.int32, (tm, tn), 0)
    col_g = j * tn + lax.broadcasted_iota(jnp.int32, (tm, tn), 1)
    keep = row_g != col_g                       # masked_fill_ of the diagonal
    if n_pad != n:                              # zero out zero-padded rows/cols
        keep = keep & (row_g < n) & (col_g < n)

    cost_s = jnp.maximum(margin + scores - d1, 0.0)
    cost_im = jnp.maximum(margin + scores - d2, 0.0)

    if not max_violation:
        # Fused hinge terms: one select, one reduction per tile.
        tile_sum = jnp.sum(jnp.where(keep, cost_s + cost_im, 0.0))
        out_ref[0, 0] = out_ref[0, 0] + tile_sum
    else:
        cost_s = jnp.where(keep, cost_s, 0.0)
        cost_im = jnp.where(keep, cost_im, 0.0)
        tile_rowmax = jnp.max(cost_s, axis=1, keepdims=True)    # (tm, 1)
        tile_colmax = jnp.max(cost_im, axis=0, keepdims=True)   # (1, tn)

        # Running max over columns (j axis) for this row tile.
        @pl.when(j == 0)
        def _reset_rowmax():
            rowmax_ref[...] = tile_rowmax

        @pl.when(j > 0)
        def _update_rowmax():
            rowmax_ref[...] = jnp.maximum(rowmax_ref[...], tile_rowmax)

        # Running max over rows (i axis) for this column tile (persists in
        # scratch across the whole grid; indexed by j on the leading axis).
        @pl.when(i == 0)
        def _reset_colmax():
            colmax_ref[j] = tile_colmax

        @pl.when(i > 0)
        def _update_colmax():
            colmax_ref[j] = jnp.maximum(colmax_ref[j], tile_colmax)

        # Finalize: row maxes complete at the last j, col maxes at the last i.
        @pl.when(j == nj - 1)
        def _acc_rowmax():
            out_ref[0, 0] = out_ref[0, 0] + jnp.sum(rowmax_ref[...])

        @pl.when(i == ni - 1)
        def _acc_colmax():
            out_ref[0, 0] = out_ref[0, 0] + jnp.sum(colmax_ref[j])


def contrastive_loss(im, s, *, margin=0.0, max_violation=False,
                     reduction="sum", tile=512):
    """Pallas implementation of ContrastiveLoss.forward (cosine similarity)."""
    assert im.ndim == 2 and im.shape == s.shape, (im.shape, s.shape)
    if reduction not in ("sum", "mean"):
        # TODO(synk): reduction='none' returns an (N,N)/(N,) tensor and
        # measure='order' uses order_sim; neither is implemented here.
        raise NotImplementedError(f"reduction={reduction!r} not supported")

    n, d = im.shape

    # Diagonal of im @ s.T computed directly (one cheap N*D XLA op) instead of
    # an in-kernel NxN eye-masked reduction.
    diag = jnp.sum(im.astype(jnp.float32) * s.astype(jnp.float32), axis=-1)

    if n <= tile:
        tm = tn = _round_up(n, 8)          # single tile == full (padded) dims
    else:
        assert tile % 128 == 0, "multi-tile path needs lane-aligned tiles"
        tm = tn = tile
    n_pad = _round_up(n, tm)

    if n_pad != n:
        pad = n_pad - n
        im_p = jnp.pad(im, ((0, pad), (0, 0)))
        s_p = jnp.pad(s, ((0, pad), (0, 0)))
        diag = jnp.pad(diag, (0, pad))
    else:
        im_p, s_p = im, s

    diag_col = diag.reshape(n_pad, 1)
    diag_row = diag.reshape(1, n_pad)

    grid = (n_pad // tm, n_pad // tn)

    kernel = functools.partial(
        _contrastive_kernel,
        n=n, n_pad=n_pad, margin=float(margin),
        max_violation=bool(max_violation),
    )

    itemsize = jnp.dtype(im.dtype).itemsize
    out = pl.pallas_call(
        kernel,
        out_shape=jax.ShapeDtypeStruct((1, 1), jnp.float32),
        grid=grid,
        in_specs=[
            pl.BlockSpec((tm, d), lambda i, j: (i, 0)),   # im row tile
            pl.BlockSpec((tn, d), lambda i, j: (j, 0)),   # s col tile (no transpose)
            pl.BlockSpec((tm, 1), lambda i, j: (i, 0)),   # diag for rows (d1)
            pl.BlockSpec((1, tn), lambda i, j: (0, j)),   # diag for cols (d2)
        ],
        out_specs=pl.BlockSpec((1, 1), lambda i, j: (0, 0),
                               memory_space=pltpu.MemorySpace.SMEM),
        scratch_shapes=[
            pltpu.VMEM((tm, 1), jnp.float32),             # running row max (cost_s)
            pltpu.VMEM((grid[1], 1, tn), jnp.float32),    # running col max (cost_im)
        ],
        compiler_params=pltpu.CompilerParams(
            # The scalar output (and the column-max scratch) are resident
            # across the whole grid, so both axes stay "arbitrary".
            # TODO(synk): per-row-tile partial outputs would let the i axis be
            # "parallel" for the 2-TensorCore v7x megacore.
            dimension_semantics=("arbitrary", "arbitrary"),
            vmem_limit_bytes=48 * 1024 * 1024,
        ),
        cost_estimate=pl.CostEstimate(
            flops=2 * n_pad * n_pad * d,
            transcendentals=0,
            bytes_accessed=2 * n_pad * d * itemsize + 8 * n_pad + 4,
        ),
    )(im_p, s_p, diag_col, diag_row)

    total = out[0, 0]
    if reduction == "mean":
        total = total / (n if max_violation else n * n)
    return total


def _reference(im, s, margin=0.0, max_violation=False, reduction="sum"):
    """Pure-JAX mirror of the PyTorch module (cosine_sim path)."""
    imf = im.astype(jnp.float32)
    sf = s.astype(jnp.float32)
    scores = imf @ sf.T
    diag = jnp.diag(scores)
    d1 = diag[:, None]
    d2 = diag[None, :]
    cost_s = jnp.maximum(margin + scores - d1, 0.0)
    cost_im = jnp.maximum(margin + scores - d2, 0.0)
    eye = jnp.eye(scores.shape[0], dtype=bool)
    cost_s = jnp.where(eye, 0.0, cost_s)
    cost_im = jnp.where(eye, 0.0, cost_im)
    if max_violation:
        cost_s = cost_s.max(axis=1)
        cost_im = cost_im.max(axis=0)
    if reduction == "sum":
        return cost_s.sum() + cost_im.sum()
    elif reduction == "mean":
        return cost_s.mean() + cost_im.mean()
    return cost_s + cost_im


if __name__ == "__main__":
    key = jax.random.PRNGKey(0)
    k1, k2, k3, k4 = jax.random.split(key, 4)

    # Small shapes consistent with the module's embedding inputs: batch=8, hidden=32.
    N, D = 8, 32
    im = jax.random.normal(k1, (N, D), dtype=jnp.float32)
    s = jax.random.normal(k2, (N, D), dtype=jnp.float32)

    cases = [
        dict(margin=0.0, max_violation=False, reduction="sum"),   # module defaults
        dict(margin=0.2, max_violation=False, reduction="mean"),
        dict(margin=0.2, max_violation=True, reduction="sum"),
    ]
    for c in cases:
        got = jax.block_until_ready(contrastive_loss(im, s, **c))
        want = _reference(im, s, **c)
        assert jnp.allclose(got, want, rtol=5e-3, atol=1e-2), (c, got, want)

    # Exercise the multi-tile + padding path with a forced lane-aligned tile.
    N2, D2 = 200, 32
    im2 = jax.random.normal(k3, (N2, D2), dtype=jnp.float32)
    s2 = jax.random.normal(k4, (N2, D2), dtype=jnp.float32)
    for c in cases:
        got = jax.block_until_ready(contrastive_loss(im2, s2, tile=128, **c))
        want = _reference(im2, s2, **c)
        assert jnp.allclose(got, want, rtol=5e-3, atol=1e-1), (c, got, want)

    print("KERNEL_OK")
</pallas_src>

<mosaic_0001>
module attributes {stable_mosaic.version = 11 : i64} {
  func.func @_contrastive_kernel(%arg0: i32, %arg1: i32, %arg2: memref<8x32xf32, #tpu.memory_space<vmem>>, %arg3: memref<8x32xf32, #tpu.memory_space<vmem>>, %arg4: memref<8x1xf32, #tpu.memory_space<vmem>>, %arg5: memref<1x8xf32, #tpu.memory_space<vmem>>, %arg6: memref<1x1xf32, #tpu.memory_space<smem>>, %arg7: memref<8x1xf32, #tpu.memory_space<vmem>>, %arg8: memref<1x1x8xf32, #tpu.memory_space<vmem>>) attributes {dimension_semantics = [#tpu.dimension_semantics<arbitrary>, #tpu.dimension_semantics<arbitrary>], iteration_bounds = array<i64: 1, 1>, scalar_prefetch = 0 : i64, scratch_operands = 2 : i64, tpu.core_type = #tpu.core_type<tc>, window_params = [{transform_indices = @transform_0, window_bounds = array<i64: 8, 32>}, {transform_indices = @transform_1, window_bounds = array<i64: 8, 32>}, {transform_indices = @transform_2, window_bounds = array<i64: 8, 1>}, {transform_indices = @transform_3, window_bounds = array<i64: 1, 8>}, {transform_indices = @transform_4, window_bounds = array<i64: 1, 1>}]} {
    %c0_i32 = arith.constant 0 : i32
    %0 = arith.cmpi eq, %arg0, %c0_i32 : i32
    %c0_i32_0 = arith.constant 0 : i32
    %1 = arith.cmpi eq, %arg1, %c0_i32_0 : i32
    %2 = arith.andi %0, %1 : i1
    %3 = arith.extui %2 : i1 to i32
    %c0_i32_1 = arith.constant 0 : i32
    %4 = arith.cmpi ne, %3, %c0_i32_1 : i32
    scf.if %4 {
      %cst_20 = arith.constant 0.000000e+00 : f32
      %c0_21 = arith.constant 0 : index
      %c0_22 = arith.constant 0 : index
      %41 = memref.load %arg6[%c0_21, %c0_22] : memref<1x1xf32, #tpu.memory_space<smem>>
      memref.store %cst_20, %arg6[%c0_21, %c0_22] : memref<1x1xf32, #tpu.memory_space<smem>>
    } else {
    }
    %c0 = arith.constant 0 : index
    %c0_2 = arith.constant 0 : index
    %5 = vector.load %arg2[%c0, %c0_2] : memref<8x32xf32, #tpu.memory_space<vmem>>, vector<8x32xf32>
    %c0_3 = arith.constant 0 : index
    %c0_4 = arith.constant 0 : index
    %6 = vector.load %arg3[%c0_3, %c0_4] : memref<8x32xf32, #tpu.memory_space<vmem>>, vector<8x32xf32>
    %cst = arith.constant dense<0.000000e+00> : vector<8x8xf32>
    %7 = tpu.matmul %5, %6, %cst {dimension_numbers = #tpu.dot_dimension_numbers<[1], [1], [0], [0], [0, 0, 1, 0], [], []>} : vector<8x32xf32>, vector<8x32xf32>, vector<8x8xf32> -> vector<8x8xf32>
    %c0_5 = arith.constant 0 : index
    %c0_6 = arith.constant 0 : index
    %8 = vector.load %arg4[%c0_5, %c0_6] : memref<8x1xf32, #tpu.memory_space<vmem>>, vector<8x1xf32>
    %c0_7 = arith.constant 0 : index
    %c0_8 = arith.constant 0 : index
    %9 = vector.load %arg5[%c0_7, %c0_8] : memref<1x8xf32, #tpu.memory_space<vmem>>, vector<1x8xf32>
    %c8_i32 = arith.constant 8 : i32
    %10 = arith.muli %arg0, %c8_i32 : i32
    %11 = tpu.iota {dimensions = array<i32: 0>} : vector<8x8xi32>
    %12 = vector.broadcast %10 : i32 to vector<8x8xi32>
    %13 = arith.addi %12, %11 : vector<8x8xi32>
    %c8_i32_9 = arith.constant 8 : i32
    %14 = arith.muli %arg1, %c8_i32_9 : i32
    %15 = tpu.iota {dimensions = array<i32: 1>} : vector<8x8xi32>
    %16 = vector.broadcast %14 : i32 to vector<8x8xi32>
    %17 = arith.addi %16, %15 : vector<8x8xi32>
    %18 = arith.cmpi ne, %13, %17 : vector<8x8xi32>
    %cst_10 = arith.constant 0.000000e+00 : f32
    %19 = vector.broadcast %cst_10 : f32 to vector<8x8xf32>
    %20 = arith.addf %19, %7 : vector<8x8xf32>
    %21 = vector.broadcast %8 : vector<8x1xf32> to vector<8x8xf32>
    %22 = arith.subf %20, %21 : vector<8x8xf32>
    %cst_11 = arith.constant 0.000000e+00 : f32
    %23 = vector.broadcast %cst_11 : f32 to vector<8x8xf32>
    %24 = arith.maximumf %22, %23 : vector<8x8xf32>
    %cst_12 = arith.constant 0.000000e+00 : f32
    %25 = vector.broadcast %cst_12 : f32 to vector<8x8xf32>
    %26 = arith.addf %25, %7 : vector<8x8xf32>
    %27 = vector.broadcast %9 : vector<1x8xf32> to vector<8x8xf32>
    %28 = arith.subf %26, %27 : vector<8x8xf32>
    %cst_13 = arith.constant 0.000000e+00 : f32
    %29 = vector.broadcast %cst_13 : f32 to vector<8x8xf32>
    %30 = arith.maximumf %28, %29 : vector<8x8xf32>
    %31 = arith.addf %24, %30 : vector<8x8xf32>
    %cst_14 = arith.constant 0.000000e+00 : f32
    %32 = vector.broadcast %cst_14 : f32 to vector<8x8xf32>
    %33 = arith.select %18, %31, %32 : vector<8x8xi1>, vector<8x8xf32>
    %34 = vector.shape_cast %33 : vector<8x8xf32> to vector<1x8x8xf32>
    %cst_15 = arith.constant dense<0.000000e+00> : vector<1xf32>
    %35 = vector.multi_reduction <add>, %34, %cst_15 [1, 2] : vector<1x8x8xf32> to vector<1xf32>
    %36 = vector.shape_cast %35 : vector<1xf32> to vector<1x1x1xf32>
    %37 = vector.extract %36[0, 0, 0] : f32 from vector<1x1x1xf32>
    %c0_16 = arith.constant 0 : index
    %c0_17 = arith.constant 0 : index
    %38 = memref.load %arg6[%c0_16, %c0_17] : memref<1x1xf32, #tpu.memory_space<smem>>
    %39 = arith.addf %38, %37 : f32
    %c0_18 = arith.constant 0 : index
    %c0_19 = arith.constant 0 : index
    %40 = memref.load %arg6[%c0_18, %c0_19] : memref<1x1xf32, #tpu.memory_space<smem>>
    memref.store %39, %arg6[%c0_18, %c0_19] : memref<1x1xf32, #tpu.memory_space<smem>>
    return
  }
  func.func @transform_0(%arg0: i32, %arg1: i32) -> (i32, i32) {
    %c0_i32 = arith.constant 0 : i32
    %c0_i32_0 = arith.constant 0 : i32
    return %arg0, %c0_i32 : i32, i32
  }
  func.func @transform_1(%arg0: i32, %arg1: i32) -> (i32, i32) {
    %c0_i32 = arith.constant 0 : i32
    %c0_i32_0 = arith.constant 0 : i32
    return %arg1, %c0_i32 : i32, i32
  }
  func.func @transform_2(%arg0: i32, %arg1: i32) -> (i32, i32) {
    %c0_i32 = arith.constant 0 : i32
    %c0_i32_0 = arith.constant 0 : i32
    return %arg0, %c0_i32 : i32, i32
  }
  func.func @transform_3(%arg0: i32, %arg1: i32) -> (i32, i32) {
    %c0_i32 = arith.constant 0 : i32
    %c0_i32_0 = arith.constant 0 : i32
    return %c0_i32, %arg1 : i32, i32
  }
  func.func @transform_4(%arg0: i32, %arg1: i32) -> (i32, i32) {
    %c0_i32 = arith.constant 0 : i32
    %c0_i32_0 = arith.constant 0 : i32
    %c0_i32_1 = arith.constant 0 : i32
    return %c0_i32, %c0_i32_0 : i32, i32
  }
}

</mosaic_0001>

<bundles_post_ra>
// kernel: tpu_custom_call.1
= control target key start
LH: loop header
LB: loop body
LE: loop exit
PB: predicated region body
PF: predicated region fallthrough
CT: control target
= control target key end

     0   :  { %9 = vsyncpa [#allocation5], 0  ;;  %s294_s0 = inlined_call_operand.vmem [shape: f32[8,32], index: 0, kind: input, shape index: {}]   ;;  %s295_s1 = inlined_call_operand.hbm [shape: f32[8,32], index: 1, kind: input, shape index: {}]   ;;  %s296_s2 = inlined_call_operand.vmem [shape: f32[8,1], index: 2, kind: input, shape index: {}]   ;;  %s297_s3 = inlined_call_operand.vmem [shape: f32[1,8], index: 3, kind: input, shape index: {}]   ;;  %s298_s4 = inlined_call_operand.hbm [shape: f32[1,1], index: 4, kind: output, shape index: {}]  }
   0x1   :  { %10 = vsyncpa [#allocation6], 0  ;;  %s231_s15 = smov [#allocation4]   ;;  %s195_s19 = scalar_lea.hbm %s295_s1, 128 }
   0x2   :  { %s19_s16 = sshll.u32 %s231_s15, 4  ;;  %p196_p0 = scmp.ne.s32.totalorder %s295_s1, %s195_s19  ;;  %s20_s16 = int_to_ptr.vmem [resolvable:$true] %s19_s16 }
   0x3   :  { %p199_p1 = scmp.lt.u32.totalorder %s195_s19, %s295_s1 }
   0x5   :  { %p201_p2 = pnand %p199_p1, %p196_p0 }
   0x7   :  { %204 = shalt.err (!%p201_p2)
}
   0x8   :  { %s205_s24 = scalar_lea.vmem %s20_s16, 128  ;;  %p210_p4 = scmp.lt.s32.totalorder %s20_s16, %s20_s16 }
   0x9   :  { %p206_p3 = scmp.ne.s32.totalorder %s20_s16, %s205_s24  ;;  %p211_p5 = scmp.lt.s32.totalorder %s205_s24, %s205_s24 }
   0xb   :  { %p212_p6 = por %p211_p5, %p210_p4 }
   0xd   :  { %p213_p7 = pnand %p212_p6, %p206_p3 }
   0xf   :  { %216 = shalt.err (!%p213_p7)
}
  0x10   :  { %22 = dma.hbm_to_vmem [thread:$0]  %s295_s1, 128, %s20_s16, [#allocation5]  }
  0x11   :  { %227 = dma.done.wait [#allocation5], 128  }
  0x12   :  { %228 = vsyncadd [#allocation5], 4294967168  ;;  %v232_v0 = vmov 0.0   ;;  %vm233_vm0 = vmmov 0   ;;  %v234_v1 = vmov 0   ;;  %vm53_vm1 = vcmask 261120  }
  0x13   :  { %181 = vmatprep.subr.mxu0 %v232_v0  ;;  %183 = vmatprep.mubr.msk.f32.mxu0 %vm233_vm0, %v232_v0  ;;  %v39_v2 = vld [vmem:[#allocation4] sm:$0xff]  ;;  %v43_v5 = vlaneseq  ;;  %vm147_vm3 = vcmask 64512   ;;  %s217_s6 = scalar_lea.hbm %s298_s4, 16 }
  0x14   :  { %194 = vset.pattern.permute.xlu0 %v234_v1  ;;  %v40_v3 = vld [vmem:[%s296_s2] sm:$0xff]  ;;  %182 = vmatpush3.xpose.msk.msra.mxu0 %vm53_vm1, %v39_v2  ;;  %p218_p8 = scmp.ne.s32.totalorder %s298_s4, %s217_s6  ;;  %p221_p9 = scmp.lt.u32.totalorder %s217_s6, %s298_s4 }
  0x15   :  { %v38_v4 = vld [vmem:[%s294_s0] sm:$0xff]  ;;  %132 = vperm.xlu0 %194, %v40_v3   ;;  %v44_v9 = vshrl.u32 %v43_v5, 7  ;;  %v49_v10 = vand.u32 127, %v43_v5 }
  0x16   :  { %v178_v7 = vld [vmem:[%s297_s3] ss:$0 sm:$0xff]  ;;  %p223_p10 = pnand %p221_p9, %p218_p8 }
  0x17   :  { %184 = vmatmul.mubr.msk.f32.vlgmr.msra.gmra.mrb[0].mxu0 %vm53_vm1, %v38_v4  ;;  %vm52_vm2 = vcmp.ne.s32.totalorder %v44_v9, %v49_v10 }
  0x94   :  { %v133_v6 = vpop.permute.xlu0 %132 }
  0xea   :  { %v126_v8 = vpop.f32.mrb[0].mxu0 }
  0xeb   :  { %v135_v11 = vsub.f32 %v126_v8, %v133_v6  ;;  %v143_v12 = vsub.f32 %v126_v8, %v178_v7  ;;  %v185_v13 = vpop.f32.mrb[1].mxu0 }
  0xed   :  { %v136_v14 = vmax.f32 %v135_v11, 0.0  ;;  %v144_v15 = vmax.f32 %v143_v12, 0.0 }
  0xef   :  { %v145_v16 = vadd.f32 %v144_v15, %v136_v14 }
  0xf1   :  { %v146_v17 = vsel %vm52_vm2, %v145_v16, 0.0 }
  0xf2   :  { %v148_v18 = vsel %vm147_vm3, %v146_v17, 0.0 }
  0xf3   :  { %149 = vadd.xlane.f32.xlu0 %v148_v18 }
 0x180   :  { %v150_v19 = vpop.xlane.xlu0 %149 }
 0x181   :  { %v151_v20 = vrot.slane %v150_v19, 4 }
 0x183   :  { %v152_v21 = vadd.f32 %v151_v20, %v150_v19 }
 0x185   :  { %v153_v22 = vrot.slane %v152_v21, 2 }
 0x187   :  { %v154_v23 = vadd.f32 %v153_v22, %v152_v21 }
 0x189   :  { %v155_v24 = vrot.slane %v154_v23, 1 }
 0x18b   :  { %v156_v25 = vadd.f32 %v155_v24, %v154_v23 }
 0x18d   :  { %186 = vpush %v156_v25 }
 0x1be   :  { %s187_s0 = spop %186 }
 0x1bf   :  { %161 = sst [smem:[#allocation7]] %s187_s0 }
 0x1c0   :  { %226 = shalt.err (!%p223_p10)
}
 0x1c1   :  { %s235_s11 = smov [#allocation7]  }
 0x1c2   :  { %169 = dma.smem_to_hbm %s235_s11, 16, %s298_s4, [#allocation6]  }
 0x1c3   :  { %229 = dma.done.wait [#allocation6], 16  }
 0x1c4   :  { %230 = vsyncadd [#allocation6], 4294967280 }
 0x1c5   :  { %173 = sfence }
 0x1c6   :  { %174 = vsyncpa [#allocation5], 1 }
 0x1c7   :  { %175 = vsyncpa [#allocation6], 1 }

</bundles_post_ra>
